<compile_context>
chip_gen: v7x
topology: tpu7x:2x2x1
jax: 0.10.0
libtpu: 0.0.40
codegen_flags: <defaults>
</compile_context>

<pallas_src>
import math

import jax
import jax.numpy as jnp
from jax.experimental import pallas as pl
from jax.experimental.pallas import tpu as pltpu


def _alpha_policy_kernel(obsT_ref, riT_ref, w1oT_ref, w1rT_ref, b1_ref,
                         wpT_ref, bp_ref, wvT_ref, bv_ref,
                         logprobT_ref, probT_ref, valueT_ref):
    # hT = relu(W1_obs^T @ obs^T + W1_ri^T @ ri^T + b1)   (num_hidden, tile_b)
    h = jnp.dot(w1oT_ref[...], obsT_ref[...], preferred_element_type=jnp.float32)
    h = h + jnp.dot(w1rT_ref[...], riT_ref[...], preferred_element_type=jnp.float32)
    h = jnp.maximum(h + b1_ref[...], 0.0)

    # policy head + numerically stable log_softmax along the action (sublane) axis
    logits = jnp.dot(wpT_ref[...], h, preferred_element_type=jnp.float32) + bp_ref[...]
    m = jnp.max(logits, axis=0, keepdims=True)
    shifted = logits - m
    e = jnp.exp(shifted)                       # single exp, reused for prob
    denom = jnp.sum(e, axis=0, keepdims=True)
    logprob = shifted - jnp.log(denom)
    prob = e / denom                           # exact division (tolerance-safe)

    # check_prob numeric fallback: bad rows (NaN / Inf / negative) -> uniform.
    is_nan = prob != prob
    is_inf = jnp.abs(prob) == jnp.inf
    bad_elem = jnp.logical_or(jnp.logical_or(is_nan, is_inf), prob < 0.0)
    bad_col = jnp.max(bad_elem.astype(jnp.float32), axis=0, keepdims=True) > 0.0
    num_actions = probT_ref.shape[0]
    uniform = 1.0 / num_actions
    probT_ref[...] = jnp.where(bad_col, jnp.float32(uniform), prob)
    logprobT_ref[...] = jnp.where(bad_col, jnp.float32(math.log(uniform)), logprob)

    # value head
    valueT_ref[...] = (jnp.dot(wvT_ref[...], h, preferred_element_type=jnp.float32)
                       + bv_ref[...])


def _round_up(x, m):
    return ((x + m - 1) // m) * m


def _pad8(x):
    return _round_up(max(int(x), 1), 8)


def _per_col_vmem_bytes(num_obs, num_rewards, num_hidden, num_actions):
    """f32 bytes of VMEM per batch column, with sublane(8)-padded block heights.

    Counts the double-buffered input/output row blocks plus the live
    whole-tile intermediates (h, logits/shifted/e, prob/logprob, value).
    """
    io = _pad8(num_obs) + _pad8(num_rewards) + 2 * _pad8(num_actions) + _pad8(num_rewards)
    interm = _pad8(num_hidden) + 6 * _pad8(num_actions) + 2 * _pad8(num_rewards)
    return 4 * (2 * io + interm)


def _choose_tile_b(n, num_obs, num_rewards, num_hidden, num_actions):
    per_col = _per_col_vmem_bytes(num_obs, num_rewards, num_hidden, num_actions)
    budget = 12 << 20          # stay under v5e's 16 MiB default scoped-VMEM limit
    cap = (budget // per_col) // 128 * 128
    cap = int(max(128, min(4096, cap)))
    return int(min(cap, _round_up(n, 128)))


def alpha_input_policy_forward(obs, reward_importance, params):
    """Fused Pallas forward of AlphaInputPolicy (default config).

    obs: (B, num_obs) or (num_obs,) float32
    reward_importance: (B, num_rewards) or (num_rewards,) float32
    params: dict with (in, out)-layout weights:
      w1: (num_obs+num_rewards, num_hidden), b1: (num_hidden,)
      wp: (num_hidden, num_actions),         bp: (num_actions,)
      wv: (num_hidden, num_rewards),         bv: (num_rewards,)
    Returns (logprob, prob, predicted_value), all float32.
    """
    squeeze = obs.ndim == 1                      # handle_batch_dim equivalent
    if squeeze:
        obs = obs[None, :]
        reward_importance = reward_importance[None, :]

    obs = obs.astype(jnp.float32)
    ri = reward_importance.astype(jnp.float32)
    n, num_obs = obs.shape
    num_rewards = ri.shape[-1]
    w1, b1 = params["w1"], params["b1"]
    wp, bp = params["wp"], params["bp"]
    wv, bv = params["wv"], params["bv"]
    num_hidden = w1.shape[-1]
    num_actions = wp.shape[-1]

    # Transposed, kernel-resident weights: batch goes on the lane axis, so the
    # tiny weights are the MXU LHS.  Splitting W1 removes the cat([obs, ri]).
    w1oT = w1[:num_obs].astype(jnp.float32).T          # (H, num_obs)
    w1rT = w1[num_obs:].astype(jnp.float32).T          # (H, num_rewards)
    wpT = wp.astype(jnp.float32).T                     # (A, H)
    wvT = wv.astype(jnp.float32).T                     # (R, H)
    b1c = b1.astype(jnp.float32).reshape(num_hidden, 1)
    bpc = bp.astype(jnp.float32).reshape(num_actions, 1)
    bvc = bv.astype(jnp.float32).reshape(num_rewards, 1)

    tile_b = _choose_tile_b(n, num_obs, num_rewards, num_hidden, num_actions)
    grid = (pl.cdiv(n, tile_b),)
    n_pad = grid[0] * tile_b

    # Lane-dense (feature, batch) layout.  The pad (if any) is fused into the
    # same transpose copy, so there is no extra HBM round-trip for alignment.
    obsT = obs.T
    riT = ri.T
    if n_pad != n:
        obsT = jnp.pad(obsT, ((0, 0), (0, n_pad - n)))
        riT = jnp.pad(riT, ((0, 0), (0, n_pad - n)))

    def batch_spec(rows):
        return pl.BlockSpec((rows, tile_b), lambda i: (0, i))

    def full_spec(a):
        # Full (tiny) array as one block; constant index -> resident in VMEM.
        return pl.BlockSpec(a.shape, lambda i: (0, 0))

    # Lane/sublane-padded VMEM footprint -> explicit vmem_limit_bytes.
    per_col = _per_col_vmem_bytes(num_obs, num_rewards, num_hidden, num_actions)
    weight_bytes = 4 * (w1oT.size + w1rT.size + wpT.size + wvT.size
                        + b1c.size + bpc.size + bvc.size)
    footprint = per_col * tile_b + 2 * weight_bytes
    vmem_limit = int(min(max(2 * footprint, 16 << 20), 32 << 20))

    logprobT, probT, valueT = pl.pallas_call(
        _alpha_policy_kernel,
        out_shape=(
            jax.ShapeDtypeStruct((num_actions, n_pad), jnp.float32),
            jax.ShapeDtypeStruct((num_actions, n_pad), jnp.float32),
            jax.ShapeDtypeStruct((num_rewards, n_pad), jnp.float32),
        ),
        grid_spec=pltpu.PrefetchScalarGridSpec(
            num_scalar_prefetch=0,
            grid=grid,
            in_specs=[
                batch_spec(num_obs),       # obs^T tile
                batch_spec(num_rewards),   # reward_importance^T tile
                full_spec(w1oT), full_spec(w1rT), full_spec(b1c),
                full_spec(wpT), full_spec(bpc),
                full_spec(wvT), full_spec(bvc),
            ],
            out_specs=(
                batch_spec(num_actions),   # logprob^T
                batch_spec(num_actions),   # prob^T
                batch_spec(num_rewards),   # predicted_value^T
            ),
        ),
        compiler_params=pltpu.CompilerParams(
            dimension_semantics=("parallel",),
            vmem_limit_bytes=vmem_limit,
        ),
    )(obsT, riT, w1oT, w1rT, b1c, wpT, bpc, wvT, bvc)

    logprob = logprobT[:, :n].T
    prob = probT[:, :n].T
    value = valueT[:, :n].T
    if squeeze:
        logprob, prob, value = logprob[0], prob[0], value[0]
    return logprob, prob, value


if __name__ == "__main__":
    key = jax.random.PRNGKey(0)
    batch, num_obs, num_rewards, num_hidden, num_actions = 16, 16, 4, 32, 8

    keys = jax.random.split(key, 8)
    obs = jax.random.normal(keys[0], (batch, num_obs), dtype=jnp.float32)
    ri = jax.random.uniform(keys[1], (batch, num_rewards), dtype=jnp.float32)

    def init_linear(kw, kb, fan_in, fan_out):
        bound = 1.0 / (fan_in ** 0.5)
        w = jax.random.uniform(kw, (fan_in, fan_out), jnp.float32, -bound, bound)
        b = jax.random.uniform(kb, (fan_out,), jnp.float32, -bound, bound)
        return w, b

    w1, b1 = init_linear(keys[2], keys[3], num_obs + num_rewards, num_hidden)
    wp, bp = init_linear(keys[4], keys[5], num_hidden, num_actions)
    wv, bv = init_linear(keys[6], keys[7], num_hidden, num_rewards)
    params = dict(w1=w1, b1=b1, wp=wp, bp=bp, wv=wv, bv=bv)

    logprob, prob, value = alpha_input_policy_forward(obs, ri, params)
    logprob, prob, value = jax.block_until_ready((logprob, prob, value))

    # Plain-JAX reference (same math as the PyTorch module with default flags).
    combined = jnp.concatenate([obs, ri], axis=-1)
    h = jnp.maximum(combined @ w1 + b1, 0.0)
    logits = h @ wp + bp
    logprob_ref = jax.nn.log_softmax(logits, axis=-1)
    prob_ref = jnp.exp(logprob_ref)
    value_ref = h @ wv + bv

    assert logprob.shape == (batch, num_actions) and logprob.dtype == jnp.float32
    assert prob.shape == (batch, num_actions) and prob.dtype == jnp.float32
    assert value.shape == (batch, num_rewards) and value.dtype == jnp.float32
    assert bool(jnp.allclose(logprob, logprob_ref, atol=5e-4, rtol=5e-4))
    assert bool(jnp.allclose(prob, prob_ref, atol=5e-4, rtol=5e-4))
    assert bool(jnp.allclose(value, value_ref, atol=5e-4, rtol=5e-4))

    print("KERNEL_OK")
</pallas_src>

<mosaic_0001>
module attributes {stable_mosaic.version = 11 : i64} {
  func.func @_alpha_policy_kernel(%arg0: i32, %arg1: memref<16x128xf32, #tpu.memory_space<vmem>>, %arg2: memref<4x128xf32, #tpu.memory_space<vmem>>, %arg3: memref<32x16xf32, #tpu.memory_space<vmem>>, %arg4: memref<32x4xf32, #tpu.memory_space<vmem>>, %arg5: memref<32x1xf32, #tpu.memory_space<vmem>>, %arg6: memref<8x32xf32, #tpu.memory_space<vmem>>, %arg7: memref<8x1xf32, #tpu.memory_space<vmem>>, %arg8: memref<4x32xf32, #tpu.memory_space<vmem>>, %arg9: memref<4x1xf32, #tpu.memory_space<vmem>>, %arg10: memref<8x128xf32, #tpu.memory_space<vmem>>, %arg11: memref<8x128xf32, #tpu.memory_space<vmem>>, %arg12: memref<4x128xf32, #tpu.memory_space<vmem>>) attributes {dimension_semantics = [#tpu.dimension_semantics<parallel>], iteration_bounds = array<i64: 1>, scalar_prefetch = 0 : i64, scratch_operands = 0 : i64, tpu.core_type = #tpu.core_type<tc>, window_params = [{transform_indices = @transform_0, window_bounds = array<i64: 16, 128>}, {transform_indices = @transform_1, window_bounds = array<i64: 4, 128>}, {pipeline_mode = #tpu.pipeline_mode<synchronous>, transform_indices = @transform_2, window_bounds = array<i64: 32, 16>}, {pipeline_mode = #tpu.pipeline_mode<synchronous>, transform_indices = @transform_3, window_bounds = array<i64: 32, 4>}, {pipeline_mode = #tpu.pipeline_mode<synchronous>, transform_indices = @transform_4, window_bounds = array<i64: 32, 1>}, {pipeline_mode = #tpu.pipeline_mode<synchronous>, transform_indices = @transform_5, window_bounds = array<i64: 8, 32>}, {pipeline_mode = #tpu.pipeline_mode<synchronous>, transform_indices = @transform_6, window_bounds = array<i64: 8, 1>}, {pipeline_mode = #tpu.pipeline_mode<synchronous>, transform_indices = @transform_7, window_bounds = array<i64: 4, 32>}, {pipeline_mode = #tpu.pipeline_mode<synchronous>, transform_indices = @transform_8, window_bounds = array<i64: 4, 1>}, {transform_indices = @transform_9, window_bounds = array<i64: 8, 128>}, {transform_indices = @transform_10, window_bounds = array<i64: 8, 128>}, {transform_indices = @transform_11, window_bounds = array<i64: 4, 128>}]} {
    %c0 = arith.constant 0 : index
    %c0_0 = arith.constant 0 : index
    %0 = vector.load %arg3[%c0, %c0_0] : memref<32x16xf32, #tpu.memory_space<vmem>>, vector<32x16xf32>
    %c0_1 = arith.constant 0 : index
    %c0_2 = arith.constant 0 : index
    %1 = vector.load %arg1[%c0_1, %c0_2] : memref<16x128xf32, #tpu.memory_space<vmem>>, vector<16x128xf32>
    %cst = arith.constant dense<0.000000e+00> : vector<32x128xf32>
    %2 = tpu.matmul %0, %1, %cst {dimension_numbers = #tpu.dot_dimension_numbers<[1], [0], [0], [1], [0, 0, 1, 1], [], []>} : vector<32x16xf32>, vector<16x128xf32>, vector<32x128xf32> -> vector<32x128xf32>
    %c0_3 = arith.constant 0 : index
    %c0_4 = arith.constant 0 : index
    %3 = vector.load %arg4[%c0_3, %c0_4] : memref<32x4xf32, #tpu.memory_space<vmem>>, vector<32x4xf32>
    %c0_5 = arith.constant 0 : index
    %c0_6 = arith.constant 0 : index
    %4 = vector.load %arg2[%c0_5, %c0_6] : memref<4x128xf32, #tpu.memory_space<vmem>>, vector<4x128xf32>
    %cst_7 = arith.constant dense<0.000000e+00> : vector<32x128xf32>
    %5 = tpu.matmul %3, %4, %cst_7 {dimension_numbers = #tpu.dot_dimension_numbers<[1], [0], [0], [1], [0, 0, 1, 1], [], []>} : vector<32x4xf32>, vector<4x128xf32>, vector<32x128xf32> -> vector<32x128xf32>
    %6 = arith.addf %2, %5 : vector<32x128xf32>
    %c0_8 = arith.constant 0 : index
    %c0_9 = arith.constant 0 : index
    %7 = vector.load %arg5[%c0_8, %c0_9] : memref<32x1xf32, #tpu.memory_space<vmem>>, vector<32x1xf32>
    %8 = vector.broadcast %7 : vector<32x1xf32> to vector<32x128xf32>
    %9 = arith.addf %6, %8 : vector<32x128xf32>
    %cst_10 = arith.constant 0.000000e+00 : f32
    %10 = vector.broadcast %cst_10 : f32 to vector<32x128xf32>
    %11 = arith.maximumf %9, %10 : vector<32x128xf32>
    %c0_11 = arith.constant 0 : index
    %c0_12 = arith.constant 0 : index
    %12 = vector.load %arg6[%c0_11, %c0_12] : memref<8x32xf32, #tpu.memory_space<vmem>>, vector<8x32xf32>
    %cst_13 = arith.constant dense<0.000000e+00> : vector<8x128xf32>
    %13 = tpu.matmul %12, %11, %cst_13 {dimension_numbers = #tpu.dot_dimension_numbers<[1], [0], [0], [1], [0, 0, 1, 1], [], []>} : vector<8x32xf32>, vector<32x128xf32>, vector<8x128xf32> -> vector<8x128xf32>
    %c0_14 = arith.constant 0 : index
    %c0_15 = arith.constant 0 : index
    %14 = vector.load %arg7[%c0_14, %c0_15] : memref<8x1xf32, #tpu.memory_space<vmem>>, vector<8x1xf32>
    %15 = vector.broadcast %14 : vector<8x1xf32> to vector<8x128xf32>
    %16 = arith.addf %13, %15 : vector<8x128xf32>
    %cst_16 = arith.constant dense<0xFF800000> : vector<128xf32>
    %17 = vector.multi_reduction <maximumf>, %16, %cst_16 [0] : vector<8x128xf32> to vector<128xf32>
    %18 = vector.shape_cast %17 : vector<128xf32> to vector<1x128xf32>
    %19 = vector.broadcast %18 : vector<1x128xf32> to vector<8x128xf32>
    %20 = arith.subf %16, %19 : vector<8x128xf32>
    %21 = math.exp %20 : vector<8x128xf32>
    %cst_17 = arith.constant dense<0.000000e+00> : vector<128xf32>
    %22 = vector.multi_reduction <add>, %21, %cst_17 [0] : vector<8x128xf32> to vector<128xf32>
    %23 = vector.shape_cast %22 : vector<128xf32> to vector<1x128xf32>
    %24 = math.log %23 : vector<1x128xf32>
    %25 = vector.broadcast %24 : vector<1x128xf32> to vector<8x128xf32>
    %26 = arith.subf %20, %25 : vector<8x128xf32>
    %27 = vector.broadcast %23 : vector<1x128xf32> to vector<8x128xf32>
    %28 = arith.divf %21, %27 : vector<8x128xf32>
    %29 = arith.cmpf one, %28, %28 : vector<8x128xf32>
    %30 = math.absf %28 : vector<8x128xf32>
    %cst_18 = arith.constant 0x7F800000 : f32
    %31 = vector.broadcast %cst_18 : f32 to vector<8x128xf32>
    %32 = arith.cmpf oeq, %30, %31 : vector<8x128xf32>
    %33 = arith.ori %29, %32 : vector<8x128xi1>
    %cst_19 = arith.constant 0.000000e+00 : f32
    %34 = vector.broadcast %cst_19 : f32 to vector<8x128xf32>
    %35 = arith.cmpf olt, %28, %34 : vector<8x128xf32>
    %36 = arith.ori %33, %35 : vector<8x128xi1>
    %37 = arith.extui %36 : vector<8x128xi1> to vector<8x128xi32>
    %38 = arith.sitofp %37 : vector<8x128xi32> to vector<8x128xf32>
    %cst_20 = arith.constant dense<0xFF800000> : vector<128xf32>
    %39 = vector.multi_reduction <maximumf>, %38, %cst_20 [0] : vector<8x128xf32> to vector<128xf32>
    %40 = vector.shape_cast %39 : vector<128xf32> to vector<1x128xf32>
    %cst_21 = arith.constant 0.000000e+00 : f32
    %41 = vector.broadcast %cst_21 : f32 to vector<1x128xf32>
    %42 = arith.cmpf ogt, %40, %41 : vector<1x128xf32>
    %cst_22 = arith.constant 1.250000e-01 : f32
    %43 = vector.shape_cast %42 : vector<1x128xi1> to vector<1x128xi1>
    %44 = vector.broadcast %43 : vector<1x128xi1> to vector<8x128xi1>
    %45 = vector.broadcast %cst_22 : f32 to vector<8x128xf32>
    %46 = arith.select %44, %45, %28 : vector<8x128xi1>, vector<8x128xf32>
    %c0_23 = arith.constant 0 : index
    %c0_24 = arith.constant 0 : index
    %47 = vector.load %arg11[%c0_23, %c0_24] : memref<8x128xf32, #tpu.memory_space<vmem>>, vector<8x128xf32>
    tpu.vector_store %arg11[%c0_23, %c0_24], %46 {strides = array<i32>} : memref<8x128xf32, #tpu.memory_space<vmem>>, vector<8x128xf32>,
    %cst_25 = arith.constant -2.07944155 : f32
    %48 = vector.shape_cast %42 : vector<1x128xi1> to vector<1x128xi1>
    %49 = vector.broadcast %48 : vector<1x128xi1> to vector<8x128xi1>
    %50 = vector.broadcast %cst_25 : f32 to vector<8x128xf32>
    %51 = arith.select %49, %50, %26 : vector<8x128xi1>, vector<8x128xf32>
    %c0_26 = arith.constant 0 : index
    %c0_27 = arith.constant 0 : index
    %52 = vector.load %arg10[%c0_26, %c0_27] : memref<8x128xf32, #tpu.memory_space<vmem>>, vector<8x128xf32>
    tpu.vector_store %arg10[%c0_26, %c0_27], %51 {strides = array<i32>} : memref<8x128xf32, #tpu.memory_space<vmem>>, vector<8x128xf32>,
    %c0_28 = arith.constant 0 : index
    %c0_29 = arith.constant 0 : index
    %53 = vector.load %arg8[%c0_28, %c0_29] : memref<4x32xf32, #tpu.memory_space<vmem>>, vector<4x32xf32>
    %cst_30 = arith.constant dense<0.000000e+00> : vector<4x128xf32>
    %54 = tpu.matmul %53, %11, %cst_30 {dimension_numbers = #tpu.dot_dimension_numbers<[1], [0], [0], [1], [0, 0, 1, 1], [], []>} : vector<4x32xf32>, vector<32x128xf32>, vector<4x128xf32> -> vector<4x128xf32>
    %c0_31 = arith.constant 0 : index
    %c0_32 = arith.constant 0 : index
    %55 = vector.load %arg9[%c0_31, %c0_32] : memref<4x1xf32, #tpu.memory_space<vmem>>, vector<4x1xf32>
    %56 = vector.broadcast %55 : vector<4x1xf32> to vector<4x128xf32>
    %57 = arith.addf %54, %56 : vector<4x128xf32>
    %c0_33 = arith.constant 0 : index
    %c0_34 = arith.constant 0 : index
    %58 = vector.load %arg12[%c0_33, %c0_34] : memref<4x128xf32, #tpu.memory_space<vmem>>, vector<4x128xf32>
    tpu.vector_store %arg12[%c0_33, %c0_34], %57 {strides = array<i32>} : memref<4x128xf32, #tpu.memory_space<vmem>>, vector<4x128xf32>,
    return
  }
  func.func @transform_0(%arg0: i32) -> (i32, i32) {
    %c0_i32 = arith.constant 0 : i32
    %c0_i32_0 = arith.constant 0 : i32
    return %c0_i32, %arg0 : i32, i32
  }
  func.func @transform_1(%arg0: i32) -> (i32, i32) {
    %c0_i32 = arith.constant 0 : i32
    %c0_i32_0 = arith.constant 0 : i32
    return %c0_i32, %arg0 : i32, i32
  }
  func.func @transform_2(%arg0: i32) -> (i32, i32) {
    %c0_i32 = arith.constant 0 : i32
    %c0_i32_0 = arith.constant 0 : i32
    %c0_i32_1 = arith.constant 0 : i32
    return %c0_i32, %c0_i32_0 : i32, i32
  }
  func.func @transform_3(%arg0: i32) -> (i32, i32) {
    %c0_i32 = arith.constant 0 : i32
    %c0_i32_0 = arith.constant 0 : i32
    %c0_i32_1 = arith.constant 0 : i32
    return %c0_i32, %c0_i32_0 : i32, i32
  }
  func.func @transform_4(%arg0: i32) -> (i32, i32) {
    %c0_i32 = arith.constant 0 : i32
    %c0_i32_0 = arith.constant 0 : i32
    %c0_i32_1 = arith.constant 0 : i32
    return %c0_i32, %c0_i32_0 : i32, i32
  }
  func.func @transform_5(%arg0: i32) -> (i32, i32) {
    %c0_i32 = arith.constant 0 : i32
    %c0_i32_0 = arith.constant 0 : i32
    %c0_i32_1 = arith.constant 0 : i32
    return %c0_i32, %c0_i32_0 : i32, i32
  }
  func.func @transform_6(%arg0: i32) -> (i32, i32) {
    %c0_i32 = arith.constant 0 : i32
    %c0_i32_0 = arith.constant 0 : i32
    %c0_i32_1 = arith.constant 0 : i32
    return %c0_i32, %c0_i32_0 : i32, i32
  }
  func.func @transform_7(%arg0: i32) -> (i32, i32) {
    %c0_i32 = arith.constant 0 : i32
    %c0_i32_0 = arith.constant 0 : i32
    %c0_i32_1 = arith.constant 0 : i32
    return %c0_i32, %c0_i32_0 : i32, i32
  }
  func.func @transform_8(%arg0: i32) -> (i32, i32) {
    %c0_i32 = arith.constant 0 : i32
    %c0_i32_0 = arith.constant 0 : i32
    %c0_i32_1 = arith.constant 0 : i32
    return %c0_i32, %c0_i32_0 : i32, i32
  }
  func.func @transform_9(%arg0: i32) -> (i32, i32) {
    %c0_i32 = arith.constant 0 : i32
    %c0_i32_0 = arith.constant 0 : i32
    return %c0_i32, %arg0 : i32, i32
  }
  func.func @transform_10(%arg0: i32) -> (i32, i32) {
    %c0_i32 = arith.constant 0 : i32
    %c0_i32_0 = arith.constant 0 : i32
    return %c0_i32, %arg0 : i32, i32
  }
  func.func @transform_11(%arg0: i32) -> (i32, i32) {
    %c0_i32 = arith.constant 0 : i32
    %c0_i32_0 = arith.constant 0 : i32
    return %c0_i32, %arg0 : i32, i32
  }
}

</mosaic_0001>

<bundles_post_ra>
// kernel: tpu_custom_call.1
= control target key start
LH: loop header
LB: loop body
LE: loop exit
PB: predicated region body
PF: predicated region fallthrough
CT: control target
= control target key end

     0   :  { %17 = vsyncpa [#allocation3], 0  ;;  %vm61_vm0 = vcmask 1043456   ;;  %vm48_vm1 = vcmask 31744   ;;  %v702_v7 = vmov 0   ;;  %vm150_vm2 = vcmask 130048   ;;  %s889_s0 = inlined_call_operand.vmem [shape: f32[16,128], index: 0, kind: input, shape index: {}]   ;;  %s890_s1 = inlined_call_operand.vmem [shape: f32[4,128], index: 1, kind: input, shape index: {}]   ;;  %s891_s2 = inlined_call_operand.vmem [shape: f32[32,16], index: 2, kind: input, shape index: {}]   ;;  %s892_s3 = inlined_call_operand.vmem [shape: f32[32,4], index: 3, kind: input, shape index: {}]   ;;  %s893_s4 = inlined_call_operand.vmem [shape: f32[32,1], index: 4, kind: input, shape index: {}]   ;;  %s894_s5 = inlined_call_operand.vmem [shape: f32[8,32], index: 5, kind: input, shape index: {}]   ;;  %s895_s6 = inlined_call_operand.vmem [shape: f32[8,1], index: 6, kind: input, shape index: {}]   ;;  %s896_s7 = inlined_call_operand.vmem [shape: f32[4,32], index: 7, kind: input, shape index: {}]   ;;  %s897_s8 = inlined_call_operand.vmem [shape: f32[4,1], index: 8, kind: input, shape index: {}]   ;;  %s898_s9 = inlined_call_operand.hbm [shape: f32[8,128], index: 9, kind: output, shape index: {0}]   ;;  %s899_s10 = inlined_call_operand.hbm [shape: f32[8,128], index: 10, kind: output, shape index: {1}]   ;;  %s900_s11 = inlined_call_operand.hbm [shape: f32[4,128], index: 11, kind: output, shape index: {2}]  }
   0x1   :  { %v47_v0 = vld [vmem:[%s890_s1] sm:$0xf]  ;;  %v44_v2 = vld [vmem:[%s892_s3 + $0x8] sm:$0xff]  ;;  %v45_v5 = vld [vmem:[%s892_s3 + $0x10] sm:$0xff]  ;;  %624 = vset.pattern.permute.xlu0 %v702_v7  ;;  %625 = vset.pattern.permute.xlu1 %v702_v7 }
   0x2   :  { %v43_v1 = vld [vmem:[%s892_s3] sm:$0xff]  ;;  %557 = vmatprep.subr.msk.mxu0 %vm61_vm0, %v47_v0  ;;  %v42_v4 = vld [vmem:[%s889_s0 + $0x8] sm:$0xff]  ;;  %v46_v9 = vld [vmem:[%s892_s3 + $0x18] sm:$0xff] }
   0x3   :  { %559 = vmatprep.mubr.msk.f32.mxu0 %vm48_vm1, %v43_v1  ;;  %v41_v3 = vld [vmem:[%s889_s0] sm:$0xff]  ;;  %558 = vmatpush3.msk.msra.mxu0 %vm61_vm0, %v47_v0  ;;  %v250_v10 = vld [vmem:[%s893_s4 + $0x10] sm:$0xff] }
   0x4   :  { %v597_v6 = vpack.c.bf16 %v42_v4, %v41_v3  ;;  %560 = vmatmul.mubr.msk.f32.vlgmr.msra.gmra.mrb[0].mxu0 %vm48_vm1, %v44_v2  ;;  %v248_v8 = vld [vmem:[%s893_s4] sm:$0xff] }
   0x5   :  { %562 = vmatprep.mubr.msk.f32.mxu0 %vm48_vm1, %v45_v5  ;;  %v37_v11 = vld [vmem:[%s891_s2] sm:$0xff]  ;;  %254 = vperm.xlu0 %624, %v248_v8  }
   0x6   :  { %598 = vmatprep.subr.bf16.mxu0 %v597_v6 }
   0x7   :  { %600 = vmatpush3.bf16.msra.mxu0 %v597_v6 }
   0x8   :  { %18 = vsyncpa [#allocation5], 0  ;;  %264 = vperm.xlu1 %625, %v250_v10   ;;  %v249_v12 = vld [vmem:[%s893_s4 + $0x8] sm:$0xff]  ;;  %563 = vmatmul.mubr.msk.f32.gmra.mrb[2].mxu0 %vm48_vm1, %v46_v9  ;;  %v251_v13 = vld [vmem:[%s893_s4 + $0x18] sm:$0xff]  ;;  %v703_v19 = vmov 0.0|0.0   ;;  %vm704_vm3 = vmmov 0  }
   0x9   :  { %569 = vmatprep.mubr.msk.f32.mxu0 %vm150_vm2, %v37_v11  ;;  %v38_v14 = vld [vmem:[%s891_s2 + $0x8] sm:$0xff]  ;;  %v39_v15 = vld [vmem:[%s891_s2 + $0x10] sm:$0xff]  ;;  %259 = vperm.xlu0 %624, %v249_v12   ;;  %v281_v16 = vld [vmem:[%s895_s6] sm:$0xff]  ;;  %v705_v20 = vmov 0.0   ;;  %vm287_vm4 = vcmask 261120   ;;  %s707_s28 = smov [#allocation2]  }
   0xa   :  { %v403_v17 = vld [vmem:[%s897_s8] sm:$0xf]  ;;  %v40_v18 = vld [vmem:[%s891_s2 + $0x18] sm:$0xff]  ;;  %601 = vmatprep.subr.bf16.mxu1 %v703_v19  ;;  %583 = vmatprep.mubr.msk.f32.mxu1 %vm704_vm3, %v705_v20  ;;  %s489_s29 = sshll.u32 %s707_s28, 4  ;;  %s708_s30 = smov [#allocation6]   ;;  %s839_s29 = int_to_ptr.vmem [resolvable:$true] %s489_s29 }
   0xb   :  { %v280_v39 = vld [vmem:[%s894_s5] sm:$0xff]  ;;  %s706_s5 = smov [#allocation4]   ;;  %s509_s0 = sshll.u32 %s708_s30, 4  ;;  %s841_s0 = int_to_ptr.vmem [resolvable:$true] %s509_s0 }
   0xc   :  { %269 = vperm.xlu1 %625, %v251_v13   ;;  %570 = vmatmul.mubr.msk.f32.vlgmr.msra.gmra.mrb[0].mxu0 %vm150_vm2, %v38_v14  ;;  %v402_v40 = vld [vmem:[%s896_s7] sm:$0xf]  ;;  %s499_s7 = sshll.u32 %s706_s5, 4  ;;  %s500_s7 = int_to_ptr.vmem [resolvable:$true] %s499_s7 }
   0xd   :  { %572 = vmatprep.mubr.msk.f32.mxu0 %vm150_vm2, %v39_v15  ;;  %284 = vperm.xlu0 %624, %v281_v16   ;;  %s632_s12 = scalar_lea.vmem %s500_s7, 128  ;;  %p637_p1 = scmp.lt.s32.totalorder %s500_s7, %s500_s7 }
   0xe   :  { %p633_p0 = scmp.ne.s32.totalorder %s500_s7, %s632_s12  ;;  %p638_p2 = scmp.lt.s32.totalorder %s632_s12, %s632_s12 }
  0x10   :  { %406 = vperm.xlu1 %625, %v403_v17   ;;  %573 = vmatmul.mubr.msk.f32.gmra.mrb[2].mxu0 %vm150_vm2, %v40_v18  ;;  %p639_p3 = por %p638_p2, %p637_p1 }
  0x12   :  { %p640_p4 = pnand %p639_p3, %p633_p0 }
  0x84   :  { %v255_v21 = vpop.permute.xlu0 %254 }
  0x87   :  { %v265_v22 = vpop.permute.xlu1 %264 }
  0x88   :  { %v260_v23 = vpop.permute.xlu0 %259 }
  0x8b   :  { %v270_v29 = vpop.permute.xlu1 %269 }
  0x8c   :  { %v285_v41 = vpop.permute.xlu0 %284 }
  0x8f   :  { %v407_v48 = vpop.permute.xlu1 %406 }
  0xdf   :  { %v571_v24 = vpop.f32.mrb[0].mxu0 }
  0xe0   :  { %v273_v25 = vadd.f32 %v571_v24, %v260_v23  ;;  %v229_v26 = vpop.f32.mrb[1].mxu0 }
  0xe1   :  { %v272_v27 = vadd.f32 %v255_v21, %v229_v26 }
  0xe2   :  { %v277_v28 = vmax.f32 %v273_v25, 0.0 }
  0xe3   :  { %v276_v30 = vmax.f32 %v272_v27, 0.0  ;;  %v574_v31 = vpop.f32.mrb[2].mxu0 }
  0xe4   :  { %v275_v32 = vadd.f32 %v574_v31, %v270_v29  ;;  %v239_v33 = vpop.f32.mrb[3].mxu0 }
  0xe5   :  { %v274_v34 = vadd.f32 %v265_v22, %v239_v33  ;;  %v602_v35 = vpack.c.bf16 %v277_v28, %v276_v30 }
  0xe6   :  { %v279_v36 = vmax.f32 %v275_v32, 0.0 }
  0xe7   :  { %v278_v37 = vmax.f32 %v274_v34, 0.0  ;;  %603 = vmatpush3.bf16.msra.mxu1 %v602_v35 }
  0xe8   :  { %604 = vmatprep.subr.bf16.mxu1 %v703_v19 }
  0xe9   :  { %v605_v38 = vpack.c.bf16 %v279_v36, %v278_v37 }
  0xeb   :  { %606 = vmatpush3.bf16.msra.mxu1 %v605_v38 }
  0xec   :  { %607 = vmatprep.subr.bf16.mxu1 %v703_v19 }
  0xee   :  { %584 = vmatmul.mubr.msk.f32.vlgmr.msra.gmra.mrb[0].mxu1 %vm287_vm4, %v280_v39 }
  0xef   :  { %609 = vmatpush3.bf16.msra.mxu1 %v602_v35  ;;  %594 = vmatprep.mubr.msk.f32.mxu1 %vm704_vm3, %v705_v20 }
  0xf0   :  { %610 = vmatprep.subr.bf16.mxu1 %v703_v19 }
  0xf3   :  { %612 = vmatpush3.bf16.msra.mxu1 %v605_v38 }
  0xf6   :  { %595 = vmatmul.mubr.msk.f32.vlgmr.msra.gmra.mrb[2].mxu1 %vm287_vm4, %v402_v40 }
 0x1c1   :  { %v357_v42 = vpop.f32.mrb[0].mxu1 }
 0x1c2   :  { %v358_v43 = vadd.f32 %v357_v42, %v285_v41  ;;  %v585_v44 = vpop.f32.mrb[1].mxu1 }
 0x1c4   :  { %v361_v45 = vrot.slane %v358_v43, 4 }
 0x1c6   :  { %v362_v46 = vmax.f32 %v358_v43, %v361_v45 }
 0x1c8   :  { %v363_v47 = vrot.slane %v362_v46, 2 }
 0x1c9   :  { %v478_v49 = vpop.f32.mrb[2].mxu1 }
 0x1ca   :  { %v364_v50 = vmax.f32 %v362_v46, %v363_v47  ;;  %v479_v51 = vadd.f32 %v478_v49, %v407_v48  ;;  %v596_v52 = vpop.f32.mrb[3].mxu1 }
 0x1cc   :  { %v365_v53 = vrot.slane %v364_v50, 1  ;;  %482 = vst [vmem:[#allocation6] sm:$0xf] %v479_v51 }
 0x1ce   :  { %v366_v54 = vmax.f32 %v364_v50, %v365_v53 }
 0x1d0   :  { %v367_v55 = vsub.f32 %v358_v43, %v366_v54 }
 0x1d2   :  { %v368_v56 = vmul.f32 1.442695, %v367_v55 }
 0x1d4   :  { %626 = vpow2.f32 %v368_v56 }
 0x1de   :  { %v627_v57 = vpop.eup %626 }
 0x1df   :  { %v370_v58 = vrot.slane %v627_v57, 4 }
 0x1e1   :  { %v371_v59 = vadd.f32 %v627_v57, %v370_v58 }
 0x1e3   :  { %v372_v60 = vrot.slane %v371_v59, 2 }
 0x1e5   :  { %v373_v61 = vadd.f32 %v372_v60, %v371_v59 }
 0x1e7   :  { %v374_v62 = vrot.slane %v373_v61, 1 }
 0x1e9   :  { %v375_v63 = vadd.f32 %v374_v62, %v373_v61 }
 0x1eb   :  { %628 = vrcp.f32 %v375_v63 }
 0x1ec   :  { %630 = vlog2.f32 %v375_v63 }
 0x1f5   :  { %v629_v0 = vpop.eup %628 }
 0x1f6   :  { %v380_v1 = vmul.f32 %v629_v0, %v627_v57  ;;  %v631_v6 = vpop.eup %630 }
 0x1f7   :  { %v377_v9 = vmul.f32 0.6931472, %v631_v6 }
 0x1f8   :  { %v382_v2 = vand.u32 2147483647, %v380_v1  ;;  %vm381_vm5 = vcmp.ne.f32.partialorder %v380_v1, %v380_v1  ;;  %vm385_vm8 = vcmp.lt.f32.partialorder %v380_v1, 0.0 }
 0x1f9   :  { %v378_v12 = vsub.f32 %v367_v55, %v377_v9 }
 0x1fa   :  { %vm383_vm6 = vcmp.eq.f32.partialorder %v382_v2, inf }
 0x1fb   :  { %vm384_vm7 = vmor %vm381_vm5, %vm383_vm6 }
 0x1fc   :  { %vm386_vm9 = vmor %vm384_vm7, %vm385_vm8 }
 0x1fd   :  { %v534_v3 = vsel %vm386_vm9, 1.0, %v705_v20 }
 0x1fe   :  { %v389_v4 = vrot.slane %v534_v3, 4 }
 0x200   :  { %v390_v5 = vmax.f32 %v534_v3, %v389_v4 }
 0x202   :  { %v391_v7 = vrot.slane %v390_v5, 2 }
 0x204   :  { %v392_v8 = vmax.f32 %v390_v5, %v391_v7 }
 0x206   :  { %v393_v10 = vrot.slane %v392_v8, 1 }
 0x208   :  { %v394_v11 = vmax.f32 %v392_v8, %v393_v10 }
 0x20a   :  { %vm395_vm10 = vcmp.gt.f32.partialorder %v394_v11, 0.0 }
 0x20b   :  { %v398_v13 = vsel %vm395_vm10, 0.125, %v380_v1  ;;  %v400_v14 = vsel %vm395_vm10, -2.0794415, %v378_v12 }
 0x20c   :  { %399 = vst [vmem:[#allocation4] sm:$0xff] %v398_v13  ;;  %401 = vst [vmem:[#allocation2] sm:$0xff] %v400_v14 }
 0x20d   :  { %643 = shalt.err (!%p640_p4)
}
 0x20e   :  { %s644_s15 = scalar_lea.hbm %s899_s10, 128 }
 0x20f   :  { %p645_p5 = scmp.ne.s32.totalorder %s899_s10, %s644_s15  ;;  %p648_p6 = scmp.lt.u32.totalorder %s644_s15, %s899_s10 }
 0x211   :  { %p650_p7 = pnand %p648_p6, %p645_p5 }
 0x213   :  { %653 = shalt.err (!%p650_p7)
}
 0x214   :  { %502 = dma.vmem_to_hbm [thread:$0]  %s500_s7, 128, %s899_s10, [#allocation5]  }
 0x215   :  { %s654_s21 = scalar_lea.vmem %s839_s29, 128  ;;  %p659_p9 = scmp.lt.s32.totalorder %s839_s29, %s839_s29 }
 0x216   :  { %p655_p8 = scmp.ne.s32.totalorder %s839_s29, %s654_s21  ;;  %p660_p10 = scmp.lt.s32.totalorder %s654_s21, %s654_s21 }
 0x218   :  { %p661_p11 = por %p660_p10, %p659_p9 }
 0x21a   :  { %p662_p12 = pnand %p661_p11, %p655_p8 }
 0x21c   :  { %665 = shalt.err (!%p662_p12)
}
 0x21d   :  { %s666_s24 = scalar_lea.hbm %s898_s9, 128 }
 0x21e   :  { %p667_p13 = scmp.ne.s32.totalorder %s898_s9, %s666_s24  ;;  %p670_p0 = scmp.lt.u32.totalorder %s666_s24, %s898_s9 }
 0x220   :  { %p672_p1 = pnand %p670_p0, %p667_p13 }
 0x222   :  { %675 = shalt.err (!%p672_p1)
}
 0x223   :  { %492 = dma.vmem_to_hbm [thread:$0]  %s839_s29, 128, %s898_s9, [#allocation3]  }
 0x224   :  { %s676_s6 = scalar_lea.vmem %s841_s0, 64  ;;  %p681_p3 = scmp.lt.s32.totalorder %s841_s0, %s841_s0 }
 0x225   :  { %p677_p2 = scmp.ne.s32.totalorder %s841_s0, %s676_s6  ;;  %p682_p4 = scmp.lt.s32.totalorder %s676_s6, %s676_s6 }
 0x227   :  { %p683_p5 = por %p682_p4, %p681_p3 }
 0x229   :  { %p684_p6 = pnand %p683_p5, %p677_p2 }
 0x22b   :  { %687 = shalt.err (!%p684_p6)
}
 0x22c   :  { %s688_s5 = scalar_lea.hbm %s900_s11, 64 }
 0x22d   :  { %p689_p7 = scmp.ne.s32.totalorder %s900_s11, %s688_s5  ;;  %p692_p8 = scmp.lt.u32.totalorder %s688_s5, %s900_s11 }
 0x22f   :  { %p694_p9 = pnand %p692_p8, %p689_p7 }
 0x231   :  { %697 = shalt.err (!%p694_p9)
}
 0x232   :  { %512 = dma.vmem_to_hbm [thread:$0]  %s841_s0, 64, %s900_s11, [#allocation5]  }
 0x233   :  { %698 = dma.done.wait [#allocation3], 128  }
 0x234   :  { %699 = vsyncadd [#allocation3], 4294967168 }
 0x235   :  { %700 = dma.done.wait [#allocation5], 192  }
 0x236   :  { %701 = vsyncadd [#allocation5], 4294967104 }
 0x237   :  { %522 = vsyncpa [#allocation3], 1 }
 0x238   :  { %523 = vsyncpa [#allocation5], 1 }

</bundles_post_ra>
